<compile_context>
chip_gen: v7x
topology: tpu7x:2x2x1
jax: 0.10.0
libtpu: 0.0.40
codegen_flags: <defaults>
</compile_context>

<pallas_src>
import jax
import jax.numpy as jnp
from jax import lax
from jax.experimental import pallas as pl
from jax.experimental.pallas import tpu as pltpu


def _moe_rkhs_router_kernel(x_ref, w_hid_t_ref, b_hid_ref,
                            w_exp_ref, emb_t_ref, b_exp_col_ref,
                            logits_ref, weights_ref):
    # rkhs_hid(input): (tT, D_in) @ (D_in, R) + (1, R) -> (tT, R)
    h = jnp.dot(x_ref[...], w_hid_t_ref[...],
                preferred_element_type=jnp.float32) + b_hid_ref[...]
    # rkhs_exp(rkhs_embeddings).T, built directly in transposed layout so the
    # logits matmul below is a plain row-major MXU matmul:
    #   rkhs_emb.T = w_exp @ emb.T + b_exp[:, None]   -> (R, E)
    e_t = jnp.dot(w_exp_ref[...], emb_t_ref[...],
                  preferred_element_type=jnp.float32) + b_exp_col_ref[...]
    # router_logits = rkhs_enc @ rkhs_emb.T -> (tT, E), no in-kernel transpose.
    logits = jnp.dot(h, e_t, preferred_element_type=jnp.float32)
    logits_ref[...] = logits.astype(logits_ref.dtype)
    # softmax over experts in f32 (matches F.softmax(..., dtype=torch.float))
    m = jnp.max(logits, axis=-1, keepdims=True)
    p = jnp.exp(logits - m)
    weights_ref[...] = (p / jnp.sum(p, axis=-1, keepdims=True)).astype(weights_ref.dtype)


def moe_rkhs_selector_forward(x, params, top_k=-1, token_tile=None):
    """JAX/Pallas equivalent of MOERKHSSelector.forward.

    x:      (B, S, D_in)
    params: dict with
      'w_hid' (R, D_in), 'b_hid' (R,)          -- rkhs_hid  Linear
      'w_exp' (R, emb),  'b_exp' (R,)          -- rkhs_exp  Linear
      'rkhs_embeddings' (E, emb)               -- one row per registered expert

    Returns (selected_experts, routing_weights, router_logits); router_logits
    is what the PyTorch module appends to info_container['routing_gates'].
    """
    B, S, D_in = x.shape
    w_hid = params["w_hid"].astype(jnp.float32)
    b_hid = params["b_hid"].astype(jnp.float32)
    w_exp = params["w_exp"].astype(jnp.float32)
    b_exp = params["b_exp"].astype(jnp.float32)
    emb = params["rkhs_embeddings"].astype(jnp.float32)

    R = w_hid.shape[0]
    E, emb_dim = emb.shape
    T = B * S

    # Layout plumbing (wrapper side): flatten tokens; pre-transpose w_hid and
    # the expert embeddings so every in-kernel matmul is lane-dense NN.
    x_flat = x.reshape(T, D_in).astype(jnp.float32)
    w_hid_t = w_hid.T                                # (D_in, R)
    b_hid_row = b_hid.reshape(1, R)                  # sublane-broadcast bias
    emb_t = emb.T                                    # (emb,  E)
    b_exp_col = b_exp.reshape(R, 1)                  # lane-broadcast bias

    # Token tile: multiple of 8 sublanes; pad the token axis so every grid
    # step sees a full block (padded rows are zeros -> finite softmax, and
    # they are sliced off below).
    if token_tile is None:
        token_tile = 512 if T >= 512 else max(8, ((T + 7) // 8) * 8)
    token_tile = max(8, ((token_tile + 7) // 8) * 8)
    grid_t = pl.cdiv(T, token_tile)
    T_pad = grid_t * token_tile
    if T_pad != T:
        x_flat = jnp.pad(x_flat, ((0, T_pad - T), (0, 0)))

    logits_flat, weights_flat = pl.pallas_call(
        _moe_rkhs_router_kernel,
        out_shape=(
            jax.ShapeDtypeStruct((T_pad, E), jnp.float32),  # router_logits
            jax.ShapeDtypeStruct((T_pad, E), jnp.float32),  # routing_weights
        ),
        grid_spec=pltpu.PrefetchScalarGridSpec(
            num_scalar_prefetch=0,
            grid=(grid_t,),
            in_specs=[
                pl.BlockSpec((token_tile, D_in), lambda i: (i, 0)),  # x tile
                pl.BlockSpec((D_in, R), lambda i: (0, 0)),           # w_hid.T
                pl.BlockSpec((1, R), lambda i: (0, 0)),              # b_hid row
                pl.BlockSpec((R, emb_dim), lambda i: (0, 0)),        # w_exp
                pl.BlockSpec((emb_dim, E), lambda i: (0, 0)),        # emb.T
                pl.BlockSpec((R, 1), lambda i: (0, 0)),              # b_exp col
            ],
            out_specs=[
                pl.BlockSpec((token_tile, E), lambda i: (i, 0)),
                pl.BlockSpec((token_tile, E), lambda i: (i, 0)),
            ],
        ),
        compiler_params=pltpu.CompilerParams(
            dimension_semantics=("parallel",)),
    )(x_flat, w_hid_t, b_hid_row, w_exp, emb_t, b_exp_col)

    router_logits = logits_flat[:T].reshape(B, S, E)
    routing_weights = weights_flat[:T].reshape(B, S, E)

    if top_k > 0:
        # TODO(synk): top-k uses lax.top_k outside the kernel; at these expert
        # counts there is no in-kernel sort/top-k primitive worth emitting.
        routing_weights, selected_experts = lax.top_k(routing_weights, top_k)
        routing_weights = routing_weights.astype(x.dtype)
    else:
        selected_experts = "all"  # SelectorOutput.ALL_EXPERTS

    return selected_experts, routing_weights, router_logits


def _build_params(key, input_dim, rkhs_dim, emb_dim, n_experts):
    """Deterministic params mirroring the PyTorch module's init."""
    k1, k2, k3, k4, k5 = jax.random.split(key, 5)
    s_hid = 1.0 / jnp.sqrt(jnp.float32(input_dim))
    s_exp = 1.0 / jnp.sqrt(jnp.float32(emb_dim))
    return {
        "w_hid": jax.random.uniform(k1, (rkhs_dim, input_dim), jnp.float32, -s_hid, s_hid),
        "b_hid": jax.random.uniform(k2, (rkhs_dim,), jnp.float32, -s_hid, s_hid),
        "w_exp": jax.random.uniform(k3, (rkhs_dim, emb_dim), jnp.float32, -s_exp, s_exp),
        "b_exp": jax.random.uniform(k4, (rkhs_dim,), jnp.float32, -s_exp, s_exp),
        # add_expert(): each expert row ~ U(-0.02, 0.02)
        "rkhs_embeddings": jax.random.uniform(
            k5, (n_experts, emb_dim), jnp.float32, -0.02, 0.02),
    }


if __name__ == "__main__":
    key = jax.random.PRNGKey(0)

    # Small shapes consistent with the module / default MOERKHSSelectorConfig.
    B, S, input_dim = 2, 8, 32
    rkhs_dim, emb_dim, n_experts = 512, 128, 8
    top_k = -1  # config default -> experts = 'all'

    key, kx, kp = jax.random.split(key, 3)
    x = jax.random.normal(kx, (B, S, input_dim), jnp.float32)
    params = _build_params(kp, input_dim, rkhs_dim, emb_dim, n_experts)

    experts, routing_weights, router_logits = moe_rkhs_selector_forward(
        x, params, top_k=top_k)
    routing_weights = jax.block_until_ready(routing_weights)
    router_logits = jax.block_until_ready(router_logits)

    # Plain-JAX reference (== the PyTorch math), high-precision matmuls.
    x_flat = x.reshape(-1, input_dim)
    h_ref = jnp.dot(x_flat, params["w_hid"].T,
                    precision=lax.Precision.HIGHEST) + params["b_hid"]
    e_ref = jnp.dot(params["rkhs_embeddings"], params["w_exp"].T,
                    precision=lax.Precision.HIGHEST) + params["b_exp"]
    logits_ref = jnp.dot(h_ref, e_ref.T,
                         precision=lax.Precision.HIGHEST).reshape(B, S, n_experts)
    weights_ref = jax.nn.softmax(logits_ref, axis=-1)

    assert experts == "all"
    assert router_logits.shape == (B, S, n_experts)
    assert routing_weights.shape == (B, S, n_experts)
    assert routing_weights.dtype == jnp.float32
    assert jnp.allclose(router_logits, logits_ref, rtol=1e-4, atol=1e-4), (
        float(jnp.max(jnp.abs(router_logits - logits_ref))))
    assert jnp.allclose(routing_weights, weights_ref, rtol=1e-4, atol=1e-4), (
        float(jnp.max(jnp.abs(routing_weights - weights_ref))))
    assert jnp.allclose(jnp.sum(routing_weights, axis=-1), 1.0, atol=1e-5)

    # Also exercise the top-k path once (result correctness vs lax reference).
    experts_k, weights_k, logits_k = moe_rkhs_selector_forward(x, params, top_k=2)
    weights_k = jax.block_until_ready(weights_k)
    wk_ref, ek_ref = lax.top_k(weights_ref, 2)
    assert jnp.allclose(weights_k, wk_ref, rtol=1e-4, atol=1e-4)
    assert jnp.array_equal(experts_k, ek_ref)

    print("KERNEL_OK")
</pallas_src>

<mosaic_0001>
module attributes {stable_mosaic.version = 11 : i64} {
  func.func @_moe_rkhs_router_kernel(%arg0: i32, %arg1: memref<16x32xf32, #tpu.memory_space<vmem>>, %arg2: memref<32x512xf32, #tpu.memory_space<vmem>>, %arg3: memref<1x512xf32, #tpu.memory_space<vmem>>, %arg4: memref<512x128xf32, #tpu.memory_space<vmem>>, %arg5: memref<128x8xf32, #tpu.memory_space<vmem>>, %arg6: memref<512x1xf32, #tpu.memory_space<vmem>>, %arg7: memref<16x8xf32, #tpu.memory_space<vmem>>, %arg8: memref<16x8xf32, #tpu.memory_space<vmem>>) attributes {dimension_semantics = [#tpu.dimension_semantics<parallel>], iteration_bounds = array<i64: 1>, scalar_prefetch = 0 : i64, scratch_operands = 0 : i64, tpu.core_type = #tpu.core_type<tc>, window_params = [{transform_indices = @transform_0, window_bounds = array<i64: 16, 32>}, {pipeline_mode = #tpu.pipeline_mode<synchronous>, transform_indices = @transform_1, window_bounds = array<i64: 32, 512>}, {pipeline_mode = #tpu.pipeline_mode<synchronous>, transform_indices = @transform_2, window_bounds = array<i64: 1, 512>}, {pipeline_mode = #tpu.pipeline_mode<synchronous>, transform_indices = @transform_3, window_bounds = array<i64: 512, 128>}, {pipeline_mode = #tpu.pipeline_mode<synchronous>, transform_indices = @transform_4, window_bounds = array<i64: 128, 8>}, {pipeline_mode = #tpu.pipeline_mode<synchronous>, transform_indices = @transform_5, window_bounds = array<i64: 512, 1>}, {transform_indices = @transform_6, window_bounds = array<i64: 16, 8>}, {transform_indices = @transform_7, window_bounds = array<i64: 16, 8>}]} {
    %c0 = arith.constant 0 : index
    %c0_0 = arith.constant 0 : index
    %0 = vector.load %arg1[%c0, %c0_0] : memref<16x32xf32, #tpu.memory_space<vmem>>, vector<16x32xf32>
    %c0_1 = arith.constant 0 : index
    %c0_2 = arith.constant 0 : index
    %1 = vector.load %arg2[%c0_1, %c0_2] : memref<32x512xf32, #tpu.memory_space<vmem>>, vector<32x512xf32>
    %cst = arith.constant dense<0.000000e+00> : vector<16x512xf32>
    %2 = tpu.matmul %0, %1, %cst {dimension_numbers = #tpu.dot_dimension_numbers<[1], [0], [0], [1], [0, 0, 1, 1], [], []>} : vector<16x32xf32>, vector<32x512xf32>, vector<16x512xf32> -> vector<16x512xf32>
    %c0_3 = arith.constant 0 : index
    %c0_4 = arith.constant 0 : index
    %3 = vector.load %arg3[%c0_3, %c0_4] : memref<1x512xf32, #tpu.memory_space<vmem>>, vector<1x512xf32>
    %4 = vector.broadcast %3 : vector<1x512xf32> to vector<16x512xf32>
    %5 = arith.addf %2, %4 : vector<16x512xf32>
    %c0_5 = arith.constant 0 : index
    %c0_6 = arith.constant 0 : index
    %6 = vector.load %arg4[%c0_5, %c0_6] : memref<512x128xf32, #tpu.memory_space<vmem>>, vector<512x128xf32>
    %c0_7 = arith.constant 0 : index
    %c0_8 = arith.constant 0 : index
    %7 = vector.load %arg5[%c0_7, %c0_8] : memref<128x8xf32, #tpu.memory_space<vmem>>, vector<128x8xf32>
    %cst_9 = arith.constant dense<0.000000e+00> : vector<512x8xf32>
    %8 = tpu.matmul %6, %7, %cst_9 {dimension_numbers = #tpu.dot_dimension_numbers<[1], [0], [0], [1], [0, 0, 1, 1], [], []>} : vector<512x128xf32>, vector<128x8xf32>, vector<512x8xf32> -> vector<512x8xf32>
    %c0_10 = arith.constant 0 : index
    %c0_11 = arith.constant 0 : index
    %9 = vector.load %arg6[%c0_10, %c0_11] : memref<512x1xf32, #tpu.memory_space<vmem>>, vector<512x1xf32>
    %10 = vector.broadcast %9 : vector<512x1xf32> to vector<512x8xf32>
    %11 = arith.addf %8, %10 : vector<512x8xf32>
    %cst_12 = arith.constant dense<0.000000e+00> : vector<16x8xf32>
    %12 = tpu.matmul %5, %11, %cst_12 {dimension_numbers = #tpu.dot_dimension_numbers<[1], [0], [0], [1], [0, 0, 1, 1], [], []>} : vector<16x512xf32>, vector<512x8xf32>, vector<16x8xf32> -> vector<16x8xf32>
    %c0_13 = arith.constant 0 : index
    %c0_14 = arith.constant 0 : index
    %13 = vector.load %arg7[%c0_13, %c0_14] : memref<16x8xf32, #tpu.memory_space<vmem>>, vector<16x8xf32>
    tpu.vector_store %arg7[%c0_13, %c0_14], %12 {strides = array<i32>} : memref<16x8xf32, #tpu.memory_space<vmem>>, vector<16x8xf32>,
    %cst_15 = arith.constant dense<0xFF800000> : vector<16xf32>
    %14 = vector.multi_reduction <maximumf>, %12, %cst_15 [1] : vector<16x8xf32> to vector<16xf32>
    %15 = vector.shape_cast %14 : vector<16xf32> to vector<16x1xf32>
    %16 = vector.broadcast %15 : vector<16x1xf32> to vector<16x8xf32>
    %17 = arith.subf %12, %16 : vector<16x8xf32>
    %18 = math.exp %17 : vector<16x8xf32>
    %cst_16 = arith.constant dense<0.000000e+00> : vector<16xf32>
    %19 = vector.multi_reduction <add>, %18, %cst_16 [1] : vector<16x8xf32> to vector<16xf32>
    %20 = vector.shape_cast %19 : vector<16xf32> to vector<16x1xf32>
    %21 = vector.broadcast %20 : vector<16x1xf32> to vector<16x8xf32>
    %22 = arith.divf %18, %21 : vector<16x8xf32>
    %c0_17 = arith.constant 0 : index
    %c0_18 = arith.constant 0 : index
    %23 = vector.load %arg8[%c0_17, %c0_18] : memref<16x8xf32, #tpu.memory_space<vmem>>, vector<16x8xf32>
    tpu.vector_store %arg8[%c0_17, %c0_18], %22 {strides = array<i32>} : memref<16x8xf32, #tpu.memory_space<vmem>>, vector<16x8xf32>,
    return
  }
  func.func @transform_0(%arg0: i32) -> (i32, i32) {
    %c0_i32 = arith.constant 0 : i32
    %c0_i32_0 = arith.constant 0 : i32
    return %arg0, %c0_i32 : i32, i32
  }
  func.func @transform_1(%arg0: i32) -> (i32, i32) {
    %c0_i32 = arith.constant 0 : i32
    %c0_i32_0 = arith.constant 0 : i32
    %c0_i32_1 = arith.constant 0 : i32
    return %c0_i32, %c0_i32_0 : i32, i32
  }
  func.func @transform_2(%arg0: i32) -> (i32, i32) {
    %c0_i32 = arith.constant 0 : i32
    %c0_i32_0 = arith.constant 0 : i32
    %c0_i32_1 = arith.constant 0 : i32
    return %c0_i32, %c0_i32_0 : i32, i32
  }
  func.func @transform_3(%arg0: i32) -> (i32, i32) {
    %c0_i32 = arith.constant 0 : i32
    %c0_i32_0 = arith.constant 0 : i32
    %c0_i32_1 = arith.constant 0 : i32
    return %c0_i32, %c0_i32_0 : i32, i32
  }
  func.func @transform_4(%arg0: i32) -> (i32, i32) {
    %c0_i32 = arith.constant 0 : i32
    %c0_i32_0 = arith.constant 0 : i32
    %c0_i32_1 = arith.constant 0 : i32
    return %c0_i32, %c0_i32_0 : i32, i32
  }
  func.func @transform_5(%arg0: i32) -> (i32, i32) {
    %c0_i32 = arith.constant 0 : i32
    %c0_i32_0 = arith.constant 0 : i32
    %c0_i32_1 = arith.constant 0 : i32
    return %c0_i32, %c0_i32_0 : i32, i32
  }
  func.func @transform_6(%arg0: i32) -> (i32, i32) {
    %c0_i32 = arith.constant 0 : i32
    %c0_i32_0 = arith.constant 0 : i32
    return %arg0, %c0_i32 : i32, i32
  }
  func.func @transform_7(%arg0: i32) -> (i32, i32) {
    %c0_i32 = arith.constant 0 : i32
    %c0_i32_0 = arith.constant 0 : i32
    return %arg0, %c0_i32 : i32, i32
  }
}

</mosaic_0001>

<bundles_post_ra>
// kernel: tpu_custom_call.1
= control target key start
LH: loop header
LB: loop body
LE: loop exit
PB: predicated region body
PF: predicated region fallthrough
CT: control target
= control target key end

     0   :  { %13 = vsyncpa [#allocation3], 0  ;;  %s1726_s24 = smov [#allocation2]   ;;  %s2685_s0 = inlined_call_operand.vmem [shape: f32[16,32], index: 0, kind: input, shape index: {}]   ;;  %s2686_s1 = inlined_call_operand.vmem [shape: f32[32,512], index: 1, kind: input, shape index: {}]   ;;  %s2687_s2 = inlined_call_operand.hbm [shape: f32[1,512], index: 2, kind: input, shape index: {}]   ;;  %s2688_s3 = inlined_call_operand.vmem [shape: f32[512,128], index: 3, kind: input, shape index: {}]   ;;  %s2689_s4 = inlined_call_operand.vmem [shape: f32[128,8], index: 4, kind: input, shape index: {}]   ;;  %s2690_s5 = inlined_call_operand.vmem [shape: f32[512,1], index: 5, kind: input, shape index: {}]   ;;  %s2691_s6 = inlined_call_operand.vmem [shape: f32[16,8], index: 6, kind: output, shape index: {0}]   ;;  %s2692_s7 = inlined_call_operand.vmem [shape: f32[16,8], index: 7, kind: output, shape index: {1}]  }
   0x1   :  { %s24_s25 = sshll.u32 %s1726_s24, 4  ;;  %s1702_s28 = scalar_lea.hbm %s2687_s2, 64  ;;  %s25_s25 = int_to_ptr.vmem [resolvable:$true] %s24_s25 }
   0x2   :  { %p1703_p0 = scmp.ne.s32.totalorder %s2687_s2, %s1702_s28  ;;  %p1706_p1 = scmp.lt.u32.totalorder %s1702_s28, %s2687_s2 }
   0x4   :  { %p1708_p2 = pnand %p1706_p1, %p1703_p0 }
   0x6   :  { %1711 = shalt.err (!%p1708_p2)
}
   0x7   :  { %s1712_s10 = scalar_lea.vmem %s25_s25, 64  ;;  %p1717_p4 = scmp.lt.s32.totalorder %s25_s25, %s25_s25 }
   0x8   :  { %p1713_p3 = scmp.ne.s32.totalorder %s25_s25, %s1712_s10  ;;  %p1718_p5 = scmp.lt.s32.totalorder %s1712_s10, %s1712_s10 }
   0xa   :  { %p1719_p6 = por %p1718_p5, %p1717_p4 }
   0xc   :  { %p1720_p7 = pnand %p1719_p6, %p1713_p3 }
   0xe   :  { %1723 = shalt.err (!%p1720_p7)
}
   0xf   :  { %27 = dma.hbm_to_vmem [thread:$0]  %s2687_s2, 64, %s25_s25, [#allocation3]  }
  0x10   :  { %1724 = dma.done.wait [#allocation3], 64  }
  0x11   :  { %1725 = vsyncadd [#allocation3], 4294967232  ;;  %v1727_v0 = vmov 0   ;;  %v1728_v1 = vmov 0.0   ;;  %v334_v2 = vld [vmem:[%s2690_s5 + $0x80] sm:$0xff]  ;;  %v40_v4 = vld [vmem:[%s2686_s1 + $0x8] sm:$0xff] }
  0x12   :  { %1693 = vset.pattern.permute.xlu1 %v1727_v0  ;;  %1692 = vset.pattern.permute.xlu0 %v1727_v0  ;;  %v318_v3 = vld [vmem:[%s2690_s5] sm:$0xff]  ;;  %v44_v5 = vld [vmem:[%s2686_s1 + $0x28] sm:$0xff]  ;;  %v42_v6 = vld [vmem:[%s2686_s1 + $0x18] sm:$0xff]  ;;  %vm77_vm0 = vcmask 261120   ;;  %vm1237_vm1 = vcmask 64512  }
  0x13   :  { %148 = vmatprep.mubr.f32.mxu0 %v1728_v1  ;;  %225 = vmatprep.mubr.f32.mxu1 %v1728_v1  ;;  %v46_v7 = vld [vmem:[%s2686_s1 + $0x38] sm:$0xff]  ;;  %v1561_v8 = vpack.c.bf16 %v44_v5, %v40_v4  ;;  %v39_v10 = vld [vmem:[%s2686_s1] sm:$0xff]  ;;  %v41_v12 = vld [vmem:[%s2686_s1 + $0x10] sm:$0xff] }
  0x14   :  { %464 = vperm.xlu0 %1692, %v334_v2   ;;  %384 = vperm.xlu1 %1693, %v318_v3   ;;  %v1569_v9 = vpack.c.bf16 %v46_v7, %v42_v6  ;;  %v43_v11 = vld [vmem:[%s2686_s1 + $0x20] sm:$0xff]  ;;  %v45_v14 = vld [vmem:[%s2686_s1 + $0x30] sm:$0xff]  ;;  %v335_v15 = vld [vmem:[%s2690_s5 + $0x88] sm:$0xff] }
  0x15   :  { %v1563_v13 = vpack.c.bf16 %v43_v11, %v39_v10  ;;  %v319_v16 = vld [vmem:[%s2690_s5 + $0x8] sm:$0xff]  ;;  %1562 = vmatprep.subr.bf16.mxu0 %v1561_v8  ;;  %v1571_v17 = vpack.c.bf16 %v45_v14, %v41_v12  ;;  %v50_v20 = vld [vmem:[%s2686_s1 + $0x58] sm:$0xff]  ;;  %v47_v23 = vld [vmem:[%s2686_s1 + $0x40] sm:$0xff] }
  0x16   :  { %1570 = vmatprep.subr.bf16.mxu1 %v1569_v9  ;;  %v48_v18 = vld [vmem:[%s2686_s1 + $0x48] sm:$0xff]  ;;  %v54_v22 = vld [vmem:[%s2686_s1 + $0x78] sm:$0xff]  ;;  %v51_v24 = vld [vmem:[%s2686_s1 + $0x60] sm:$0xff] }
  0x17   :  { %v52_v19 = vld [vmem:[%s2686_s1 + $0x68] sm:$0xff]  ;;  %1564 = vmatpush1.bf16.msra.mxu0 %v1563_v13  ;;  %1572 = vmatpush1.bf16.msra.mxu1 %v1571_v17  ;;  %v1573_v25 = vpack.c.bf16 %v54_v22, %v50_v20  ;;  %v1567_v26 = vpack.c.bf16 %v51_v24, %v47_v23  ;;  %v49_v27 = vld [vmem:[%s2686_s1 + $0x50] sm:$0xff]  ;;  %v337_v31 = vld [vmem:[%s2690_s5 + $0x98] sm:$0xff] }
  0x18   :  { %469 = vperm.xlu0 %1692, %v335_v15   ;;  %v1565_v21 = vpack.c.bf16 %v52_v19, %v48_v18  ;;  %389 = vperm.xlu1 %1693, %v319_v16   ;;  %v53_v28 = vld [vmem:[%s2686_s1 + $0x70] sm:$0xff]  ;;  %v302_v32 = vld [vmem:[%s2689_s4] sm:$0xff]  ;;  %v303_v33 = vld [vmem:[%s2689_s4 + $0x8] sm:$0xff] }
  0x19   :  { %v336_v29 = vld [vmem:[%s2690_s5 + $0x90] sm:$0xff]  ;;  %v1575_v30 = vpack.c.bf16 %v53_v28, %v49_v27  ;;  %1574 = vmatprep.subr.bf16.mxu1 %v1573_v25  ;;  %v37_v34 = vld [vmem:[%s2685_s0] sm:$0xff]  ;;  %v1577_v35 = vpack.c.bf16 %v303_v33, %v302_v32  ;;  %v305_v37 = vld [vmem:[%s2689_s4 + $0x18] sm:$0xff] }
  0x1a   :  { %1566 = vmatprep.subr.bf16.mxu0 %v1565_v21  ;;  %v304_v36 = vld [vmem:[%s2689_s4 + $0x10] sm:$0xff]  ;;  %v321_v40 = vld [vmem:[%s2690_s5 + $0x18] sm:$0xff]  ;;  %v306_v41 = vld [vmem:[%s2689_s4 + $0x20] sm:$0xff] }
  0x1b   :  { %1568 = vmatpush1.bf16.msra.mxu0 %v1567_v26  ;;  %1576 = vmatpush1.bf16.msra.mxu1 %v1575_v30  ;;  %v320_v38 = vld [vmem:[%s2690_s5 + $0x10] sm:$0xff]  ;;  %v1581_v39 = vpack.c.bf16 %v305_v37, %v304_v36  ;;  %v307_v42 = vld [vmem:[%s2689_s4 + $0x28] sm:$0xff]  ;;  %v338_v43 = vld [vmem:[%s2690_s5 + $0xa0] sm:$0xff] }
  0x1c   :  { %474 = vperm.xlu0 %1692, %v336_v29   ;;  %479 = vperm.xlu1 %1693, %v337_v31   ;;  %v1585_v44 = vpack.c.bf16 %v307_v42, %v306_v41  ;;  %v339_v45 = vld [vmem:[%s2690_s5 + $0xa8] sm:$0xff]  ;;  %v308_v46 = vld [vmem:[%s2689_s4 + $0x30] sm:$0xff]  ;;  %v309_v47 = vld [vmem:[%s2689_s4 + $0x38] sm:$0xff] }
  0x1d   :  { %1578 = vmatprep.subr.bf16.mxu0 %v1577_v35  ;;  %1673 = vmatprep.subr.bf16.mxu1 %v1577_v35  ;;  %v38_v48 = vld [vmem:[%s2685_s0 + $0x8] sm:$0xff]  ;;  %v322_v49 = vld [vmem:[%s2690_s5 + $0x20] sm:$0xff]  ;;  %v1589_v50 = vpack.c.bf16 %v309_v47, %v308_v46  ;;  %v280_v55 = vld [vmem:[%s2688_s3 + $0x150] sm:$0xff] }
  0x1e   :  { %1273 = vmatmul.mubr.msk.f32.vlgmr.msra.gmra.mrb[0].mxu0 %vm77_vm0, %v37_v34  ;;  %1275 = vmatmul.mubr.msk.f32.vlgmr.msra.gmra.mrb[0].mxu1 %vm77_vm0, %v37_v34  ;;  %v323_v51 = vld [vmem:[%s2690_s5 + $0x28] sm:$0xff]  ;;  %v310_v52 = vld [vmem:[%s2689_s4 + $0x40] sm:$0xff]  ;;  %v340_v56 = vld [vmem:[%s2690_s5 + $0xb0] sm:$0xff] }
  0x1f   :  { %1580 = vmatpush3.bf16.msra.mxu0 %v1577_v35  ;;  %1681 = vmatpush3.bf16.msra.mxu1 %v1577_v35  ;;  %v311_v53 = vld [vmem:[%s2689_s4 + $0x48] sm:$0xff]  ;;  %v238_v54 = vld [vmem:[%s2688_s3] sm:$0xff]  ;;  %v341_v58 = vld [vmem:[%s2690_s5 + $0xb8] sm:$0xff] }
  0x20   :  { %394 = vperm.xlu0 %1692, %v320_v38   ;;  %399 = vperm.xlu1 %1693, %v321_v40   ;;  %v1593_v57 = vpack.c.bf16 %v311_v53, %v310_v52  ;;  %v312_v59 = vld [vmem:[%s2689_s4 + $0x50] sm:$0xff]  ;;  %v313_v60 = vld [vmem:[%s2689_s4 + $0x58] sm:$0xff]  ;;  %v314_v0 = vld [vmem:[%s2689_s4 + $0x60] sm:$0xff] }
  0x21   :  { %1582 = vmatprep.subr.bf16.mxu0 %v1581_v39  ;;  %1674 = vmatprep.subr.bf16.mxu1 %v1581_v39  ;;  %v324_v61 = vld [vmem:[%s2690_s5 + $0x30] sm:$0xff]  ;;  %v1597_v62 = vpack.c.bf16 %v313_v60, %v312_v59  ;;  %v325_v63 = vld [vmem:[%s2690_s5 + $0x38] sm:$0xff]  ;;  %v342_v2 = vld [vmem:[%s2690_s5 + $0xc0] sm:$0xff] }
  0x22   :  { %154 = vmatprep.mubr.f32.mxu0 %v1728_v1  ;;  %231 = vmatprep.mubr.f32.mxu1 %v1728_v1  ;;  %v315_v1 = vld [vmem:[%s2689_s4 + $0x68] sm:$0xff]  ;;  %v316_v5 = vld [vmem:[%s2689_s4 + $0x70] sm:$0xff]  ;;  %v317_v6 = vld [vmem:[%s2689_s4 + $0x78] sm:$0xff] }
  0x23   :  { %1584 = vmatpush3.bf16.msra.mxu0 %v1581_v39  ;;  %1682 = vmatpush3.bf16.msra.mxu1 %v1581_v39  ;;  %v1601_v3 = vpack.c.bf16 %v315_v1, %v314_v0  ;;  %v343_v4 = vld [vmem:[%s2690_s5 + $0xc8] sm:$0xff]  ;;  %v326_v7 = vld [vmem:[%s2690_s5 + $0x40] sm:$0xff]  ;;  %v1605_v8 = vpack.c.bf16 %v317_v6, %v316_v5  ;;  %v344_v10 = vld [vmem:[%s2690_s5 + $0xd0] sm:$0xff] }
  0x24   :  { %484 = vperm.xlu0 %1692, %v338_v43   ;;  %489 = vperm.xlu1 %1693, %v339_v45   ;;  %v327_v9 = vld [vmem:[%s2690_s5 + $0x48] sm:$0xff]  ;;  %v345_v11 = vld [vmem:[%s2690_s5 + $0xd8] sm:$0xff]  ;;  %v240_v14 = vld [vmem:[%s2688_s3 + $0x10] sm:$0xff] }
  0x25   :  { %1586 = vmatprep.subr.bf16.mxu0 %v1585_v44  ;;  %1675 = vmatprep.subr.bf16.mxu1 %v1585_v44  ;;  %v239_v12 = vld [vmem:[%s2688_s3 + $0x8] sm:$0xff]  ;;  %v281_v13 = vld [vmem:[%s2688_s3 + $0x158] sm:$0xff]  ;;  %v328_v15 = vld [vmem:[%s2690_s5 + $0x50] sm:$0xff] }
  0x26   :  { %1274 = vmatmul.mubr.msk.f32.gmra.mrb[2].mxu0 %vm77_vm0, %v38_v48  ;;  %1276 = vmatmul.mubr.msk.f32.gmra.mrb[2].mxu1 %vm77_vm0, %v38_v48  ;;  %v282_v16 = vld [vmem:[%s2688_s3 + $0x160] sm:$0xff]  ;;  %v329_v17 = vld [vmem:[%s2690_s5 + $0x58] sm:$0xff]  ;;  %v283_v19 = vld [vmem:[%s2688_s3 + $0x168] sm:$0xff] }
  0x27   :  { %1588 = vmatpush3.bf16.msra.mxu0 %v1585_v44  ;;  %1683 = vmatpush3.bf16.msra.mxu1 %v1585_v44  ;;  %v241_v18 = vld [vmem:[%s2688_s3 + $0x18] sm:$0xff]  ;;  %v242_v20 = vld [vmem:[%s2688_s3 + $0x20] sm:$0xff]  ;;  %v284_v22 = vld [vmem:[%s2688_s3 + $0x170] sm:$0xff] }
  0x28   :  { %404 = vperm.xlu0 %1692, %v322_v49   ;;  %409 = vperm.xlu1 %1693, %v323_v51   ;;  %v346_v21 = vld [vmem:[%s2690_s5 + $0xe0] sm:$0xff]  ;;  %v347_v23 = vld [vmem:[%s2690_s5 + $0xe8] sm:$0xff]  ;;  %v285_v25 = vld [vmem:[%s2688_s3 + $0x178] sm:$0xff] }
  0x29   :  { %1590 = vmatprep.subr.bf16.mxu0 %v1589_v50  ;;  %1676 = vmatprep.subr.bf16.mxu1 %v1589_v50  ;;  %v243_v24 = vld [vmem:[%s2688_s3 + $0x28] sm:$0xff]  ;;  %v244_v26 = vld [vmem:[%s2688_s3 + $0x30] sm:$0xff]  ;;  %v330_v27 = vld [vmem:[%s2690_s5 + $0x60] sm:$0xff] }
  0x2a   :  { %1465 = vmatprep.mubr.f32.mxu0 %v238_v54  ;;  %1528 = vmatprep.mubr.f32.mxu1 %v280_v55  ;;  %v286_v28 = vld [vmem:[%s2688_s3 + $0x180] sm:$0xff]  ;;  %v331_v29 = vld [vmem:[%s2690_s5 + $0x68] sm:$0xff]  ;;  %v245_v30 = vld [vmem:[%s2688_s3 + $0x38] sm:$0xff] }
  0x2b   :  { %1592 = vmatpush3.bf16.msra.mxu0 %v1589_v50  ;;  %1684 = vmatpush3.bf16.msra.mxu1 %v1589_v50  ;;  %v287_v31 = vld [vmem:[%s2688_s3 + $0x188] sm:$0xff]  ;;  %v246_v32 = vld [vmem:[%s2688_s3 + $0x40] sm:$0xff]  ;;  %v348_v33 = vld [vmem:[%s2690_s5 + $0xf0] sm:$0xff] }
  0x2c   :  { %494 = vperm.xlu0 %1692, %v340_v56   ;;  %499 = vperm.xlu1 %1693, %v341_v58   ;;  %v288_v34 = vld [vmem:[%s2688_s3 + $0x190] sm:$0xff]  ;;  %v349_v35 = vld [vmem:[%s2690_s5 + $0xf8] sm:$0xff]  ;;  %v247_v36 = vld [vmem:[%s2688_s3 + $0x48] sm:$0xff] }
  0x2d   :  { %1594 = vmatprep.subr.bf16.mxu0 %v1593_v57  ;;  %1677 = vmatprep.subr.bf16.mxu1 %v1593_v57  ;;  %v289_v37 = vld [vmem:[%s2688_s3 + $0x198] sm:$0xff]  ;;  %v248_v38 = vld [vmem:[%s2688_s3 + $0x50] sm:$0xff]  ;;  %v290_v40 = vld [vmem:[%s2688_s3 + $0x1a0] sm:$0xff] }
  0x2e   :  { %v332_v39 = vld [vmem:[%s2690_s5 + $0x70] sm:$0xff]  ;;  %v333_v41 = vld [vmem:[%s2690_s5 + $0x78] sm:$0xff]  ;;  %v291_v43 = vld [vmem:[%s2688_s3 + $0x1a8] sm:$0xff] }
  0x2f   :  { %1596 = vmatpush3.bf16.msra.mxu0 %v1593_v57  ;;  %1685 = vmatpush3.bf16.msra.mxu1 %v1593_v57  ;;  %v249_v42 = vld [vmem:[%s2688_s3 + $0x58] sm:$0xff]  ;;  %v250_v44 = vld [vmem:[%s2688_s3 + $0x60] sm:$0xff]  ;;  %v292_v46 = vld [vmem:[%s2688_s3 + $0x1b0] sm:$0xff] }
  0x30   :  { %414 = vperm.xlu0 %1692, %v324_v61   ;;  %419 = vperm.xlu1 %1693, %v325_v63   ;;  %v366_v45 = vld [vmem:[%s2690_s5 + $0x180] sm:$0xff]  ;;  %v367_v47 = vld [vmem:[%s2690_s5 + $0x188] sm:$0xff]  ;;  %v293_v49 = vld [vmem:[%s2688_s3 + $0x1b8] sm:$0xff] }
  0x31   :  { %1598 = vmatprep.subr.bf16.mxu0 %v1597_v62  ;;  %1678 = vmatprep.subr.bf16.mxu1 %v1597_v62  ;;  %v251_v48 = vld [vmem:[%s2688_s3 + $0x68] sm:$0xff]  ;;  %v252_v50 = vld [vmem:[%s2688_s3 + $0x70] sm:$0xff]  ;;  %v350_v51 = vld [vmem:[%s2690_s5 + $0x100] sm:$0xff] }
  0x32   :  { %v294_v52 = vld [vmem:[%s2688_s3 + $0x1c0] sm:$0xff]  ;;  %v351_v53 = vld [vmem:[%s2690_s5 + $0x108] sm:$0xff]  ;;  %v253_v54 = vld [vmem:[%s2688_s3 + $0x78] sm:$0xff] }
  0x33   :  { %1600 = vmatpush3.bf16.msra.mxu0 %v1597_v62  ;;  %1686 = vmatpush3.bf16.msra.mxu1 %v1597_v62  ;;  %v295_v55 = vld [vmem:[%s2688_s3 + $0x1c8] sm:$0xff]  ;;  %v254_v56 = vld [vmem:[%s2688_s3 + $0x80] sm:$0xff]  ;;  %v368_v57 = vld [vmem:[%s2690_s5 + $0x190] sm:$0xff] }
  0x34   :  { %504 = vperm.xlu0 %1692, %v342_v2   ;;  %509 = vperm.xlu1 %1693, %v343_v4   ;;  %v296_v58 = vld [vmem:[%s2688_s3 + $0x1d0] sm:$0xff]  ;;  %v369_v59 = vld [vmem:[%s2690_s5 + $0x198] sm:$0xff]  ;;  %v255_v60 = vld [vmem:[%s2688_s3 + $0x88] sm:$0xff] }
  0x35   :  { %1602 = vmatprep.subr.bf16.mxu0 %v1601_v3  ;;  %1679 = vmatprep.subr.bf16.mxu1 %v1601_v3  ;;  %v297_v61 = vld [vmem:[%s2688_s3 + $0x1d8] sm:$0xff]  ;;  %v256_v62 = vld [vmem:[%s2688_s3 + $0x90] sm:$0xff]  ;;  %v298_v0 = vld [vmem:[%s2688_s3 + $0x1e0] sm:$0xff] }
  0x36   :  { %v352_v63 = vld [vmem:[%s2690_s5 + $0x110] sm:$0xff]  ;;  %v353_v1 = vld [vmem:[%s2690_s5 + $0x118] sm:$0xff]  ;;  %v258_v4 = vld [vmem:[%s2688_s3 + $0xa0] sm:$0xff] }
  0x37   :  { %1604 = vmatpush3.bf16.msra.mxu0 %v1601_v3  ;;  %1687 = vmatpush3.bf16.msra.mxu1 %v1601_v3  ;;  %v257_v2 = vld [vmem:[%s2688_s3 + $0x98] sm:$0xff]  ;;  %v299_v3 = vld [vmem:[%s2688_s3 + $0x1e8] sm:$0xff]  ;;  %v370_v5 = vld [vmem:[%s2690_s5 + $0x1a0] sm:$0xff] }
  0x38   :  { %424 = vperm.xlu0 %1692, %v326_v7   ;;  %429 = vperm.xlu1 %1693, %v327_v9   ;;  %v300_v6 = vld [vmem:[%s2688_s3 + $0x1f0] sm:$0xff]  ;;  %v371_v7 = vld [vmem:[%s2690_s5 + $0x1a8] sm:$0xff]  ;;  %v301_v9 = vld [vmem:[%s2688_s3 + $0x1f8] sm:$0xff] }
  0x39   :  { %1606 = vmatprep.subr.bf16.mxu0 %v1605_v8  ;;  %1680 = vmatprep.subr.bf16.mxu1 %v1605_v8 }
  0x3b   :  { %1608 = vmatpush3.bf16.msra.mxu0 %v1605_v8  ;;  %1688 = vmatpush3.bf16.msra.mxu1 %v1605_v8  ;;  %v259_v8 = vld [vmem:[%s2688_s3 + $0xa8] sm:$0xff] }
  0x3c   :  { %514 = vperm.xlu0 %1692, %v344_v10   ;;  %519 = vperm.xlu1 %1693, %v345_v11   ;;  %v260_v10 = vld [vmem:[%s2688_s3 + $0xb0] sm:$0xff]  ;;  %v354_v11 = vld [vmem:[%s2690_s5 + $0x120] sm:$0xff] }
  0x3e   :  { %1466 = vmatmul.mubr.f32.vlgmr.msra.gmra.mrb[4].mxu0 %v239_v12  ;;  %1529 = vmatmul.mubr.f32.vlgmr.msra.gmra.mrb[4].mxu1 %v281_v13  ;;  %v355_v12 = vld [vmem:[%s2690_s5 + $0x128] sm:$0xff]  ;;  %v261_v13 = vld [vmem:[%s2688_s3 + $0xb8] sm:$0xff] }
  0x3f   :  { %1468 = vmatprep.mubr.f32.mxu0 %v240_v14  ;;  %1531 = vmatprep.mubr.f32.mxu1 %v282_v16  ;;  %v262_v14 = vld [vmem:[%s2688_s3 + $0xc0] sm:$0xff]  ;;  %v373_v16 = vld [vmem:[%s2690_s5 + $0x1b8] sm:$0xff] }
  0x40   :  { %434 = vperm.xlu0 %1692, %v328_v15   ;;  %439 = vperm.xlu1 %1693, %v329_v17   ;;  %v372_v15 = vld [vmem:[%s2690_s5 + $0x1b0] sm:$0xff]  ;;  %v263_v17 = vld [vmem:[%s2688_s3 + $0xc8] sm:$0xff] }
  0x42   :  { %1469 = vmatmul.mubr.f32.gmra.mrb[6].mxu0 %v241_v18  ;;  %1532 = vmatmul.mubr.f32.gmra.mrb[6].mxu1 %v283_v19  ;;  %v264_v18 = vld [vmem:[%s2688_s3 + $0xd0] sm:$0xff]  ;;  %v57_v19 = vlaneseq }
  0x43   :  { %1471 = vmatprep.mubr.f32.mxu0 %v242_v20  ;;  %1534 = vmatprep.mubr.f32.mxu1 %v284_v22  ;;  %v356_v20 = vld [vmem:[%s2690_s5 + $0x130] sm:$0xff] }
  0x44   :  { %524 = vperm.xlu0 %1692, %v346_v21   ;;  %529 = vperm.xlu1 %1693, %v347_v23   ;;  %v357_v21 = vld [vmem:[%s2690_s5 + $0x138] sm:$0xff]  ;;  %v2182_v22 = vshrl.u32 %v57_v19, 7 }
  0x45   :  { %v265_v23 = vld [vmem:[%s2688_s3 + $0xd8] sm:$0xff] }
  0x46   :  { %1472 = vmatmul.mubr.f32.gmra.mrb[8].mxu0 %v243_v24  ;;  %1535 = vmatmul.mubr.f32.gmra.mrb[8].mxu1 %v285_v25  ;;  %v266_v24 = vld [vmem:[%s2688_s3 + $0xe0] sm:$0xff] }
  0x47   :  { %1474 = vmatprep.mubr.f32.mxu0 %v244_v26  ;;  %1537 = vmatprep.mubr.f32.mxu1 %v286_v28  ;;  %v2190_v25 = vld [vmem:[#allocation2] sm:$0xf]  ;;  %v59_v26 = vsub.s32 0, %v2182_v22  ;;  %v375_v28 = vld [vmem:[%s2690_s5 + $0x1c8] sm:$0xff] }
  0x48   :  { %444 = vperm.xlu0 %1692, %v330_v27   ;;  %449 = vperm.xlu1 %1693, %v331_v29   ;;  %v374_v27 = vld [vmem:[%s2690_s5 + $0x1c0] sm:$0xff] }
  0x49   :  { %v2200_v29 = vrot.slane %v2190_v25, %v59_v26 }
  0x4a   :  { %1475 = vmatmul.mubr.f32.gmra.mrb[10].mxu0 %v245_v30  ;;  %1538 = vmatmul.mubr.f32.gmra.mrb[10].mxu1 %v287_v31  ;;  %v267_v30 = vld [vmem:[%s2688_s3 + $0xe8] sm:$0xff]  ;;  %v268_v31 = vld [vmem:[%s2688_s3 + $0xf0] sm:$0xff] }
  0x4b   :  { %1477 = vmatprep.mubr.f32.mxu0 %v246_v32  ;;  %1540 = vmatprep.mubr.f32.mxu1 %v288_v34  ;;  %v358_v32 = vld [vmem:[%s2690_s5 + $0x140] sm:$0xff]  ;;  %v269_v34 = vld [vmem:[%s2688_s3 + $0xf8] sm:$0xff] }
  0x4c   :  { %534 = vperm.xlu0 %1692, %v348_v33   ;;  %539 = vperm.xlu1 %1693, %v349_v35   ;;  %v359_v33 = vld [vmem:[%s2690_s5 + $0x148] sm:$0xff]  ;;  %v270_v35 = vld [vmem:[%s2688_s3 + $0x100] sm:$0xff] }
  0x4e   :  { %1478 = vmatmul.mubr.f32.gmra.mrb[12].mxu0 %v247_v36  ;;  %1541 = vmatmul.mubr.f32.gmra.mrb[12].mxu1 %v289_v37  ;;  %v376_v36 = vld [vmem:[%s2690_s5 + $0x1d0] sm:$0xff]  ;;  %v377_v37 = vld [vmem:[%s2690_s5 + $0x1d8] sm:$0xff] }
  0x4f   :  { %1480 = vmatprep.mubr.f32.mxu0 %v248_v38  ;;  %1543 = vmatprep.mubr.f32.mxu1 %v290_v40  ;;  %v271_v38 = vld [vmem:[%s2688_s3 + $0x108] sm:$0xff]  ;;  %v360_v40 = vld [vmem:[%s2690_s5 + $0x150] sm:$0xff] }
  0x50   :  { %454 = vperm.xlu0 %1692, %v332_v39   ;;  %459 = vperm.xlu1 %1693, %v333_v41   ;;  %v272_v39 = vld [vmem:[%s2688_s3 + $0x110] sm:$0xff]  ;;  %v361_v41 = vld [vmem:[%s2690_s5 + $0x158] sm:$0xff] }
  0x52   :  { %1481 = vmatmul.mubr.f32.gmra.mrb[14].mxu0 %v249_v42  ;;  %1544 = vmatmul.mubr.f32.gmra.mrb[14].mxu1 %v291_v43  ;;  %v273_v42 = vld [vmem:[%s2688_s3 + $0x118] sm:$0xff]  ;;  %v274_v43 = vld [vmem:[%s2688_s3 + $0x120] sm:$0xff] }
  0x53   :  { %1483 = vmatprep.mubr.f32.mxu0 %v250_v44  ;;  %1546 = vmatprep.mubr.f32.mxu1 %v292_v46  ;;  %v378_v44 = vld [vmem:[%s2690_s5 + $0x1e0] sm:$0xff]  ;;  %v275_v46 = vld [vmem:[%s2688_s3 + $0x128] sm:$0xff] }
  0x54   :  { %624 = vperm.xlu0 %1692, %v366_v45   ;;  %629 = vperm.xlu1 %1693, %v367_v47   ;;  %v379_v45 = vld [vmem:[%s2690_s5 + $0x1e8] sm:$0xff]  ;;  %v276_v47 = vld [vmem:[%s2688_s3 + $0x130] sm:$0xff] }
  0x56   :  { %1484 = vmatmul.mubr.f32.gmra.mrb[16].mxu0 %v251_v48  ;;  %1547 = vmatmul.mubr.f32.gmra.mrb[16].mxu1 %v293_v49  ;;  %v362_v48 = vld [vmem:[%s2690_s5 + $0x160] sm:$0xff]  ;;  %v363_v49 = vld [vmem:[%s2690_s5 + $0x168] sm:$0xff] }
  0x57   :  { %1486 = vmatprep.mubr.f32.mxu0 %v252_v50  ;;  %1549 = vmatprep.mubr.f32.mxu1 %v294_v52  ;;  %v277_v50 = vld [vmem:[%s2688_s3 + $0x138] sm:$0xff]  ;;  %v380_v52 = vld [vmem:[%s2690_s5 + $0x1f0] sm:$0xff] }
  0x58   :  { %544 = vperm.xlu0 %1692, %v350_v51   ;;  %549 = vperm.xlu1 %1693, %v351_v53   ;;  %v278_v51 = vld [vmem:[%s2688_s3 + $0x140] sm:$0xff]  ;;  %v381_v53 = vld [vmem:[%s2690_s5 + $0x1f8] sm:$0xff] }
  0x5a   :  { %1487 = vmatmul.mubr.f32.gmra.mrb[18].mxu0 %v253_v54  ;;  %1550 = vmatmul.mubr.f32.gmra.mrb[18].mxu1 %v295_v55  ;;  %v279_v54 = vld [vmem:[%s2688_s3 + $0x148] sm:$0xff]  ;;  %v67_v55 = vsub.s32 2, %v2182_v22 }
  0x5b   :  { %1489 = vmatprep.mubr.f32.mxu0 %v254_v56  ;;  %1552 = vmatprep.mubr.f32.mxu1 %v296_v58  ;;  %v71_v56 = vsub.s32 3, %v2182_v22  ;;  %v365_v58 = vld [vmem:[%s2690_s5 + $0x178] sm:$0xff] }
  0x5c   :  { %634 = vperm.xlu0 %1692, %v368_v57   ;;  %639 = vperm.xlu1 %1693, %v369_v59   ;;  %v364_v57 = vld [vmem:[%s2690_s5 + $0x170] sm:$0xff]  ;;  %v2286_v59 = vrot.slane %v2190_v25, %v67_v55 }
  0x5e   :  { %1490 = vmatmul.mubr.f32.gmra.mrb[20].mxu0 %v255_v60  ;;  %1553 = vmatmul.mubr.f32.gmra.mrb[20].mxu1 %v297_v61  ;;  %v2289_v60 = vrot.slane %v2190_v25, %v71_v56 }
  0x5f   :  { %1492 = vmatprep.mubr.f32.mxu0 %v256_v62  ;;  %1555 = vmatprep.mubr.f32.mxu1 %v298_v0 }
  0x60   :  { %554 = vperm.xlu0 %1692, %v352_v63   ;;  %559 = vperm.xlu1 %1693, %v353_v1  }
  0x62   :  { %1493 = vmatmul.mubr.f32.gmra.mrb[22].mxu0 %v257_v2  ;;  %1556 = vmatmul.mubr.f32.gmra.mrb[22].mxu1 %v299_v3 }
  0x63   :  { %1495 = vmatprep.mubr.f32.mxu0 %v258_v4  ;;  %1558 = vmatprep.mubr.f32.mxu1 %v300_v6 }
  0x64   :  { %644 = vperm.xlu0 %1692, %v370_v5   ;;  %649 = vperm.xlu1 %1693, %v371_v7  }
  0x66   :  { %1496 = vmatmul.mubr.f32.gmra.mrb[24].mxu0 %v259_v8  ;;  %1559 = vmatmul.mubr.f32.gmra.mrb[24].mxu1 %v301_v9 }
  0x67   :  { %1498 = vmatprep.mubr.f32.mxu0 %v260_v10 }
  0x68   :  { %564 = vperm.xlu0 %1692, %v354_v11   ;;  %569 = vperm.xlu1 %1693, %v355_v12  }
  0x6a   :  { %1499 = vmatmul.mubr.f32.gmra.mrb[26].mxu0 %v261_v13 }
  0x6b   :  { %1501 = vmatprep.mubr.f32.mxu0 %v262_v14 }
  0x6c   :  { %654 = vperm.xlu0 %1692, %v372_v15   ;;  %659 = vperm.xlu1 %1693, %v373_v16  }
  0x6e   :  { %1502 = vmatmul.mubr.f32.gmra.mrb[28].mxu0 %v263_v17 }
  0x6f   :  { %1504 = vmatprep.mubr.f32.mxu0 %v264_v18 }
  0x70   :  { %574 = vperm.xlu0 %1692, %v356_v20   ;;  %579 = vperm.xlu1 %1693, %v357_v21  }
  0x72   :  { %1505 = vmatmul.mubr.f32.gmra.mrb[30].mxu0 %v265_v23 }
  0x73   :  { %1507 = vmatprep.mubr.f32.mxu0 %v266_v24 }
  0x74   :  { %664 = vperm.xlu0 %1692, %v374_v27   ;;  %669 = vperm.xlu1 %1693, %v375_v28  }
  0x76   :  { %1508 = vmatmul.mubr.f32.gmra.mrb[32].mxu0 %v267_v30 }
  0x77   :  { %1510 = vmatprep.mubr.f32.mxu0 %v268_v31 }
  0x78   :  { %584 = vperm.xlu0 %1692, %v358_v32   ;;  %589 = vperm.xlu1 %1693, %v359_v33  }
  0x7a   :  { %1511 = vmatmul.mubr.f32.gmra.mrb[34].mxu0 %v269_v34 }
  0x7b   :  { %1513 = vmatprep.mubr.f32.mxu0 %v270_v35 }
  0x7c   :  { %674 = vperm.xlu0 %1692, %v376_v36   ;;  %679 = vperm.xlu1 %1693, %v377_v37  }
  0x7e   :  { %1514 = vmatmul.mubr.f32.gmra.mrb[36].mxu0 %v271_v38 }
  0x7f   :  { %1516 = vmatprep.mubr.f32.mxu0 %v272_v39 }
  0x80   :  { %594 = vperm.xlu0 %1692, %v360_v40   ;;  %599 = vperm.xlu1 %1693, %v361_v41  }
  0x82   :  { %1517 = vmatmul.mubr.f32.gmra.mrb[38].mxu0 %v273_v42 }
  0x83   :  { %1519 = vmatprep.mubr.f32.mxu0 %v274_v43 }
  0x84   :  { %684 = vperm.xlu0 %1692, %v378_v44   ;;  %689 = vperm.xlu1 %1693, %v379_v45   ;;  %v63_v45 = vsub.s32 1, %v2182_v22 }
  0x86   :  { %1520 = vmatmul.mubr.f32.gmra.mrb[40].mxu0 %v275_v46 }
  0x87   :  { %1522 = vmatprep.mubr.f32.mxu0 %v276_v47 }
  0x88   :  { %604 = vperm.xlu0 %1692, %v362_v48   ;;  %609 = vperm.xlu1 %1693, %v363_v49   ;;  %v64_v48 = vrot.slane %v2190_v25, %v63_v45 }
  0x8a   :  { %1523 = vmatmul.mubr.f32.gmra.mrb[42].mxu0 %v277_v50 }
  0x8b   :  { %1525 = vmatprep.mubr.f32.mxu0 %v278_v51 }
  0x8c   :  { %694 = vperm.xlu0 %1692, %v380_v52   ;;  %699 = vperm.xlu1 %1693, %v381_v53  }
  0x8e   :  { %1526 = vmatmul.mubr.f32.gmra.mrb[44].mxu0 %v279_v54 }
  0x90   :  { %614 = vperm.xlu0 %1692, %v364_v57   ;;  %619 = vperm.xlu1 %1693, %v365_v58  }
  0x93   :  { %v2291_v61 = vpop.permute.xlu0 %464  ;;  %v2293_v62 = vpop.permute.xlu1 %384 }
  0x97   :  { %v2295_v63 = vpop.permute.xlu0 %469  ;;  %v2297_v0 = vpop.permute.xlu1 %389 }
  0x9b   :  { %v2299_v1 = vpop.permute.xlu0 %474  ;;  %v2301_v2 = vpop.permute.xlu1 %479 }
  0x9f   :  { %v2303_v3 = vpop.permute.xlu0 %394  ;;  %v2305_v4 = vpop.permute.xlu1 %399 }
  0xa3   :  { %v2307_v5 = vpop.permute.xlu0 %484  ;;  %v2309_v6 = vpop.permute.xlu1 %489 }
  0xa7   :  { %v2311_v7 = vpop.permute.xlu0 %404  ;;  %v2313_v8 = vpop.permute.xlu1 %409 }
  0xab   :  { %v2315_v9 = vpop.permute.xlu0 %494  ;;  %v2317_v10 = vpop.permute.xlu1 %499 }
  0xaf   :  { %v2319_v11 = vpop.permute.xlu0 %414  ;;  %v2321_v12 = vpop.permute.xlu1 %419 }
  0xb3   :  { %v2323_v13 = vpop.permute.xlu0 %504  ;;  %v2325_v14 = vpop.permute.xlu1 %509 }
  0xb7   :  { %v2327_v15 = vpop.permute.xlu0 %424  ;;  %v2329_v16 = vpop.permute.xlu1 %429 }
  0xbb   :  { %v2331_v17 = vpop.permute.xlu0 %514  ;;  %v2333_v18 = vpop.permute.xlu1 %519 }
  0xbf   :  { %v2335_v19 = vpop.permute.xlu0 %434  ;;  %v2337_v20 = vpop.permute.xlu1 %439 }
  0xc3   :  { %v2339_v21 = vpop.permute.xlu0 %524  ;;  %v2341_v23 = vpop.permute.xlu1 %529 }
  0xc7   :  { %v2343_v24 = vpop.permute.xlu0 %444  ;;  %v2345_v26 = vpop.permute.xlu1 %449 }
  0xcb   :  { %v2347_v27 = vpop.permute.xlu0 %534  ;;  %v2349_v28 = vpop.permute.xlu1 %539 }
  0xcf   :  { %v2351_v30 = vpop.permute.xlu0 %454  ;;  %v2353_v31 = vpop.permute.xlu1 %459 }
  0xd3   :  { %v2355_v32 = vpop.permute.xlu0 %624  ;;  %v2357_v33 = vpop.permute.xlu1 %629 }
  0xd7   :  { %v2359_v34 = vpop.permute.xlu0 %544  ;;  %v2361_v35 = vpop.permute.xlu1 %549 }
  0xd8   :  { %2696 = vst [vmem:[#allocation5_spill] sm:$0xff] %v2359_v34  ;;  %2697 = vst [vmem:[#allocation6_spill] sm:$0xff] %v2361_v35 }
  0xdb   :  { %v2363_v36 = vpop.permute.xlu0 %634  ;;  %v2365_v37 = vpop.permute.xlu1 %639 }
  0xdf   :  { %v2367_v38 = vpop.permute.xlu0 %554  ;;  %v2369_v39 = vpop.permute.xlu1 %559 }
  0xe0   :  { %2698 = vst [vmem:[#allocation7_spill] sm:$0xff] %v2367_v38  ;;  %2699 = vst [vmem:[#allocation8_spill] sm:$0xff] %v2369_v39 }
  0xe3   :  { %v2371_v40 = vpop.permute.xlu0 %644  ;;  %v2373_v41 = vpop.permute.xlu1 %649 }
  0xe7   :  { %v2375_v42 = vpop.permute.xlu0 %564  ;;  %v2377_v43 = vpop.permute.xlu1 %569 }
  0xe8   :  { %2700 = vst [vmem:[#allocation9_spill] sm:$0xff] %v2375_v42  ;;  %2701 = vst [vmem:[#allocation10_spill] sm:$0xff] %v2377_v43 }
  0xeb   :  { %v2379_v44 = vpop.permute.xlu0 %654  ;;  %v2382_v46 = vpop.permute.xlu1 %659 }
  0xef   :  { %v2384_v47 = vpop.permute.xlu0 %574  ;;  %v2387_v49 = vpop.permute.xlu1 %579 }
  0xf0   :  { %2702 = vst [vmem:[#allocation11_spill] sm:$0xff] %v2384_v47  ;;  %2703 = vst [vmem:[#allocation12_spill] sm:$0xff] %v2387_v49 }
  0xf1   :  { %v150_v50 = vpop.f32.mrb[0].mxu0  ;;  %v227_v53 = vpop.f32.mrb[0].mxu1 }
  0xf2   :  { %v2390_v51 = vadd.f32 %v150_v50, %v2200_v29  ;;  %v152_v52 = vpop.f32.mrb[1].mxu0  ;;  %v2395_v56 = vadd.f32 %v227_v53, %v2286_v59  ;;  %v229_v22 = vpop.f32.mrb[1].mxu1 }
  0xf3   :  { %v153_v54 = vadd.f32 %v152_v52, %v64_v48  ;;  %v2392_v55 = vpop.permute.xlu0 %664  ;;  %v2397_v57 = vpop.permute.xlu1 %669  ;;  %v2400_v58 = vadd.f32 %v229_v22, %v2289_v60 }
  0xf4   :  { %2704 = vst [vmem:[#allocation13_spill] sm:$0xff] %v2390_v51  ;;  %2705 = vst [vmem:[#allocation14_spill] sm:$0xff] %v2395_v56 }
  0xf5   :  { %2706 = vst [vmem:[#allocation15_spill] sm:$0xff] %v2400_v58  ;;  %1151 = vmatprep.mubr.f32.mxu1 %v153_v54 }
  0xf7   :  { %v2402_v25 = vpop.permute.xlu0 %584  ;;  %v2404_v45 = vpop.permute.xlu1 %589 }
  0xf8   :  { %2707 = vst [vmem:[#allocation16_spill] sm:$0xff] %v2402_v25  ;;  %2708 = vst [vmem:[#allocation17_spill] sm:$0xff] %v2404_v45 }
  0xf9   :  { %v156_v50 = vpop.f32.mrb[2].mxu0  ;;  %v233_v49 = vpop.f32.mrb[2].mxu1 }
  0xfa   :  { %v2407_v47 = vadd.f32 %v156_v50, %v2200_v29  ;;  %v158_v52 = vpop.f32.mrb[3].mxu0  ;;  %v2412_v53 = vadd.f32 %v233_v49, %v2286_v59  ;;  %v235_v56 = vpop.f32.mrb[3].mxu1 }
  0xfb   :  { %v2409_v42 = vadd.f32 %v158_v52, %v64_v48  ;;  %v2414_v43 = vpop.permute.xlu1 %679  ;;  %v2417_v54 = vadd.f32 %v235_v56, %v2289_v60  ;;  %v2419_v22 = vpop.permute.xlu0 %674 }
  0xfc   :  { %2709 = vst [vmem:[#allocation18_spill] sm:$0xff] %v2407_v47  ;;  %2711 = vst [vmem:[#allocation20_spill] sm:$0xff] %v2412_v53 }
  0xfd   :  { %2710 = vst [vmem:[#allocation19_spill] sm:$0xff] %v2409_v42  ;;  %2712 = vst [vmem:[#allocation21_spill] sm:$0xff] %v2417_v54 }
  0xff   :  { %v600_v25 = vpop.permute.xlu1 %599  ;;  %v595_v45 = vpop.permute.xlu0 %594 }
 0x103   :  { %v2421_v58 = vpop.permute.xlu1 %689  ;;  %v2423_v29 = vpop.permute.xlu0 %684 }
 0x107   :  { %v610_v50 = vpop.permute.xlu1 %609  ;;  %v605_v48 = vpop.permute.xlu0 %604 }
 0x10b   :  { %v2428_v47 = vpop.permute.xlu1 %699  ;;  %v2437_v51 = vpop.permute.xlu0 %694 }
 0x111   :  { %v1467_v52 = vpop.f32.mrb[4].mxu0  ;;  %v1530_v49 = vpop.f32.mrb[4].mxu1 }
 0x112   :  { %v2426_v59 = vadd.f32 %v1467_v52, %v2297_v0  ;;  %v768_v53 = vpop.f32.mrb[5].mxu0  ;;  %v2430_v60 = vadd.f32 %v1530_v49, %v600_v25  ;;  %v978_v54 = vpop.f32.mrb[5].mxu1 }
 0x113   :  { %v2433_v56 = vadd.f32 %v768_v53, %v2293_v62  ;;  %v2435_v42 = vadd.f32 %v978_v54, %v595_v45  ;;  %v620_v54 = vpop.permute.xlu1 %619 }
 0x115   :  { %2713 = vst [vmem:[#allocation22_spill] sm:$0xff] %v2435_v42  ;;  %v1470_v39 = vpop.f32.mrb[6].mxu0  ;;  %v1533_v25 = vpop.f32.mrb[6].mxu1 }
 0x116   :  { %v2444_v52 = vadd.f32 %v1470_v39, %v2305_v4  ;;  %v778_v49 = vpop.f32.mrb[7].mxu0  ;;  %v2446_v34 = vadd.f32 %v1533_v25, %v610_v50  ;;  %v988_v45 = vpop.f32.mrb[7].mxu1 }
 0x117   :  { %v2449_v62 = vadd.f32 %v778_v49, %v2303_v3  ;;  %v2451_v53 = vadd.f32 %v988_v45, %v605_v48  ;;  %v615_v25 = vpop.permute.xlu0 %614 }
 0x119   :  { %2714 = vst [vmem:[#allocation23_spill] sm:$0xff] %v2451_v53  ;;  %v1473_v35 = vpop.f32.mrb[8].mxu0  ;;  %v1536_v39 = vpop.f32.mrb[8].mxu1 }
 0x11a   :  { %v2458_v4 = vadd.f32 %v1473_v35, %v2313_v8  ;;  %v788_v50 = vpop.f32.mrb[9].mxu0  ;;  %v2460_v42 = vadd.f32 %v1536_v39, %v620_v54  ;;  %v998_v48 = vpop.f32.mrb[9].mxu1 }
 0x11b   :  { %v2463_v3 = vadd.f32 %v788_v50, %v2311_v7  ;;  %v2465_v49 = vadd.f32 %v998_v48, %v615_v25 }
 0x11d   :  { %2715 = vst [vmem:[#allocation24_spill] sm:$0xff] %v2465_v49  ;;  %v1476_v38 = vpop.f32.mrb[10].mxu0  ;;  %v1539_v35 = vpop.f32.mrb[10].mxu1 }
 0x11e   :  { %v2472_v8 = vadd.f32 %v1476_v38, %v2321_v12  ;;  %v798_v53 = vpop.f32.mrb[11].mxu0  ;;  %v2475_v54 = vadd.f32 %v1539_v35, %v2357_v33  ;;  %v1008_v39 = vpop.f32.mrb[11].mxu1 }
 0x11f   :  { %v2478_v7 = vadd.f32 %v798_v53, %v2319_v11  ;;  %v2481_v50 = vadd.f32 %v1008_v39, %v2355_v32 }
 0x121   :  { %v1479_v48 = vpop.f32.mrb[12].mxu0  ;;  %v1542_v0 = vpop.f32.mrb[12].mxu1 }
 0x122   :  { %v2488_v38 = vadd.f32 %v1479_v48, %v2329_v16  ;;  %v808_v33 = vpop.f32.mrb[13].mxu0  ;;  %v2491_v35 = vadd.f32 %v1542_v0, %v2365_v37  ;;  %v1018_v32 = vpop.f32.mrb[13].mxu1 }
 0x123   :  { %v2494_v11 = vadd.f32 %v808_v33, %v2327_v15  ;;  %v2497_v53 = vadd.f32 %v1018_v32, %v2363_v36 }
 0x125   :  { %v1482_v25 = vpop.f32.mrb[14].mxu0  ;;  %v1545_v12 = vpop.f32.mrb[14].mxu1 }
 0x126   :  { %v2504_v48 = vadd.f32 %v1482_v25, %v2337_v20  ;;  %v818_v37 = vpop.f32.mrb[15].mxu0  ;;  %v2507_v0 = vadd.f32 %v1545_v12, %v2373_v41  ;;  %v1028_v36 = vpop.f32.mrb[15].mxu1 }
 0x127   :  { %v2510_v15 = vadd.f32 %v818_v37, %v2335_v19  ;;  %v2513_v33 = vadd.f32 %v1028_v36, %v2371_v40 }
 0x129   :  { %v1485_v39 = vpop.f32.mrb[16].mxu0  ;;  %v1548_v16 = vpop.f32.mrb[16].mxu1 }
 0x12a   :  { %v2520_v25 = vadd.f32 %v1485_v39, %v2345_v26  ;;  %v828_v41 = vpop.f32.mrb[17].mxu0  ;;  %v2523_v12 = vadd.f32 %v1548_v16, %v2382_v46  ;;  %v1038_v40 = vpop.f32.mrb[17].mxu1 }
 0x12b   :  { %v2526_v19 = vadd.f32 %v828_v41, %v2343_v24  ;;  %v2529_v37 = vadd.f32 %v1038_v40, %v2379_v44 }
 0x12d   :  { %v1488_v32 = vpop.f32.mrb[18].mxu0  ;;  %v1551_v20 = vpop.f32.mrb[18].mxu1 }
 0x12e   :  { %v2536_v39 = vadd.f32 %v1488_v32, %v2353_v31  ;;  %v838_v46 = vpop.f32.mrb[19].mxu0  ;;  %v2539_v16 = vadd.f32 %v1551_v20, %v2397_v57  ;;  %v1048_v44 = vpop.f32.mrb[19].mxu1 }
 0x12f   :  { %v2542_v24 = vadd.f32 %v838_v46, %v2351_v30  ;;  %v2545_v41 = vadd.f32 %v1048_v44, %v2392_v55 }
 0x131   :  { %v1491_v36 = vpop.f32.mrb[20].mxu0  ;;  %v1554_v26 = vpop.f32.mrb[20].mxu1 }
 0x132   :  { %v854_v32 = vadd.f32 %v1491_v36, %v2295_v63  ;;  %v848_v45 = vpop.f32.mrb[21].mxu0  ;;  %v2553_v57 = vadd.f32 %v1554_v26, %v2414_v43  ;;  %v1058_v20 = vpop.f32.mrb[21].mxu1 }
 0x133   :  { %v849_v30 = vadd.f32 %v848_v45, %v2291_v61  ;;  %v2557_v55 = vadd.f32 %v1058_v20, %v2419_v22  ;;  %v2716_v22 = vpack.c.bf16 %v2426_v59, %v2433_v56  ;;  %v2717_v59 = vpack.c.bf16 %v2444_v52, %v2449_v62 }
 0x135   :  { %v1609_v46 = vpack.c.bf16 %v854_v32, %v849_v30  ;;  %v1494_v44 = vpop.f32.mrb[22].mxu0  ;;  %v1661_v40 = vpack.c.bf16 %v2553_v57, %v2557_v55  ;;  %v1557_v49 = vpop.f32.mrb[22].mxu1  ;;  %v2751_v57 = vld [vmem:[#allocation20_spill] sm:$0xff] }
 0x136   :  { %v864_v31 = vadd.f32 %v1494_v44, %v2301_v2  ;;  %v858_v63 = vpop.f32.mrb[23].mxu0  ;;  %v2563_v36 = vadd.f32 %v1557_v49, %v2421_v58  ;;  %v1068_v26 = vpop.f32.mrb[23].mxu1 }
 0x137   :  { %v859_v43 = vadd.f32 %v858_v63, %v2299_v1  ;;  %1610 = vmatprep.subr.bf16.mxu1 %v1609_v46  ;;  %v2567_v61 = vadd.f32 %v1068_v26, %v2423_v29 }
 0x138   :  { %1612 = vmatpush3.bf16.msra.mxu1 %v2716_v22  ;;  %v2719_v22 = vpack.c.bf16 %v2472_v8, %v2478_v7  ;;  %v2721_v7 = vpack.c.bf16 %v2504_v48, %v2510_v15  ;;  %v2725_v15 = vpack.c.bf16 %v2536_v39, %v2542_v24  ;;  %v2731_v39 = vpack.c.bf16 %v2491_v35, %v2497_v53  ;;  %v2732_v24 = vld [vmem:[#allocation10_spill] sm:$0xff]  ;;  %v2738_v53 = vld [vmem:[#allocation11_spill] sm:$0xff] }
 0x139   :  { %v1613_v45 = vpack.c.bf16 %v864_v31, %v859_v43  ;;  %v1497_v32 = vpop.f32.mrb[24].mxu0  ;;  %v1665_v2 = vpack.c.bf16 %v2563_v36, %v2567_v61  ;;  %v1560_v58 = vpop.f32.mrb[24].mxu1 }
 0x13a   :  { %v874_v30 = vadd.f32 %v1497_v32, %v2309_v6  ;;  %v868_v49 = vpop.f32.mrb[25].mxu0  ;;  %v2576_v1 = vadd.f32 %v1560_v58, %v2428_v47  ;;  %v1078_v29 = vpop.f32.mrb[25].mxu1 }
 0x13b   :  { %v869_v20 = vadd.f32 %v868_v49, %v2307_v5  ;;  %1614 = vmatprep.subr.bf16.mxu1 %v1613_v45  ;;  %v2580_v46 = vadd.f32 %v1078_v29, %v2437_v51  ;;  %v2718_v5 = vpack.c.bf16 %v2458_v4, %v2463_v3  ;;  %v2720_v3 = vpack.c.bf16 %v2488_v38, %v2494_v11 }
 0x13c   :  { %1616 = vmatpush3.bf16.msra.mxu1 %v2717_v59  ;;  %v2722_v11 = vpack.c.bf16 %v2520_v25, %v2526_v19  ;;  %v2727_v25 = vld [vmem:[#allocation8_spill] sm:$0xff] }
 0x13d   :  { %v1617_v56 = vpack.c.bf16 %v874_v30, %v869_v20  ;;  %v1500_v31 = vpop.f32.mrb[26].mxu0  ;;  %v1669_v6 = vpack.c.bf16 %v2576_v1, %v2580_v46 }
 0x13e   :  { %v884_v44 = vadd.f32 %v1500_v31, %v2317_v10  ;;  %v878_v47 = vpop.f32.mrb[27].mxu0  ;;  %v2724_v31 = vld [vmem:[#allocation5_spill] sm:$0xff] }
 0x13f   :  { %v879_v63 = vadd.f32 %v878_v47, %v2315_v9  ;;  %1618 = vmatprep.subr.bf16.mxu1 %v1617_v56 }
 0x140   :  { %1620 = vmatpush3.bf16.msra.mxu1 %v2718_v5 }
 0x141   :  { %v1621_v51 = vpack.c.bf16 %v884_v44, %v879_v63  ;;  %v1503_v43 = vpop.f32.mrb[28].mxu0  ;;  %v2728_v63 = vld [vmem:[#allocation7_spill] sm:$0xff] }
 0x142   :  { %v894_v52 = vadd.f32 %v1503_v43, %v2325_v14  ;;  %v888_v62 = vpop.f32.mrb[29].mxu0  ;;  %v2730_v43 = vld [vmem:[#allocation19_spill] sm:$0xff] }
 0x143   :  { %v889_v26 = vadd.f32 %v888_v62, %v2323_v13  ;;  %1622 = vmatprep.subr.bf16.mxu1 %v1621_v51  ;;  %v2729_v51 = vld [vmem:[#allocation13_spill] sm:$0xff] }
 0x144   :  { %1624 = vmatpush3.bf16.msra.mxu1 %v2719_v22 }
 0x145   :  { %v1625_v10 = vpack.c.bf16 %v894_v52, %v889_v26  ;;  %v1506_v45 = vpop.f32.mrb[30].mxu0 }
 0x146   :  { %v904_v9 = vadd.f32 %v1506_v45, %v2333_v18  ;;  %v898_v32 = vpop.f32.mrb[31].mxu0  ;;  %v2735_v45 = vld [vmem:[#allocation15_spill] sm:$0xff] }
 0x147   :  { %v899_v4 = vadd.f32 %v898_v32, %v2331_v17  ;;  %1626 = vmatprep.subr.bf16.mxu1 %v1625_v10  ;;  %v2734_v10 = vld [vmem:[#allocation18_spill] sm:$0xff] }
 0x148   :  { %1628 = vmatpush3.bf16.msra.mxu1 %v2720_v3  ;;  %v2737_v3 = vld [vmem:[#allocation12_spill] sm:$0xff] }
 0x149   :  { %v1629_v14 = vpack.c.bf16 %v904_v9, %v899_v4  ;;  %v1509_v30 = vpop.f32.mrb[32].mxu0  ;;  %v2736_v4 = vpack.c.bf16 %v2507_v0, %v2513_v33  ;;  %v2742_v33 = vpack.c.bf16 %v2539_v16, %v2545_v41  ;;  %v2747_v16 = vld [vmem:[#allocation24_spill] sm:$0xff] }
 0x14a   :  { %v914_v13 = vadd.f32 %v1509_v30, %v2341_v23  ;;  %v908_v58 = vpop.f32.mrb[33].mxu0  ;;  %v2748_v41 = vpack.c.bf16 %v2460_v42, %v2747_v16 }
 0x14b   :  { %v909_v8 = vadd.f32 %v908_v58, %v2339_v21  ;;  %1630 = vmatprep.subr.bf16.mxu1 %v1629_v14  ;;  %v2723_v21 = vld [vmem:[#allocation6_spill] sm:$0xff] }
 0x14c   :  { %1632 = vmatpush3.bf16.msra.mxu1 %v2721_v7  ;;  %v2740_v7 = vld [vmem:[#allocation17_spill] sm:$0xff] }
 0x14d   :  { %v1633_v18 = vpack.c.bf16 %v914_v13, %v909_v8  ;;  %v1512_v49 = vpop.f32.mrb[34].mxu0  ;;  %v2739_v8 = vpack.c.bf16 %v2523_v12, %v2529_v37  ;;  %v2745_v37 = vld [vmem:[#allocation23_spill] sm:$0xff] }
 0x14e   :  { %v924_v17 = vadd.f32 %v1512_v49, %v2349_v28  ;;  %v918_v20 = vpop.f32.mrb[35].mxu0 }
 0x14f   :  { %v919_v38 = vadd.f32 %v918_v20, %v2347_v27  ;;  %1634 = vmatprep.subr.bf16.mxu1 %v1633_v18  ;;  %v2726_v27 = vpack.c.bf16 %v2475_v54, %v2481_v50  ;;  %v2733_v50 = vld [vmem:[#allocation9_spill] sm:$0xff] }
 0x150   :  { %1636 = vmatpush3.bf16.msra.mxu1 %v2722_v11  ;;  %v2746_v11 = vpack.c.bf16 %v2446_v34, %v2745_v37 }
 0x151   :  { %v1637_v23 = vpack.c.bf16 %v924_v17, %v919_v38  ;;  %v1515_v29 = vpop.f32.mrb[36].mxu0  ;;  %v2741_v17 = vld [vmem:[#allocation16_spill] sm:$0xff]  ;;  %v2743_v38 = vld [vmem:[#allocation22_spill] sm:$0xff] }
 0x152   :  { %v934_v59 = vadd.f32 %v1515_v29, %v2723_v21  ;;  %v928_v56 = vpop.f32.mrb[37].mxu0  ;;  %v2744_v12 = vpack.c.bf16 %v2430_v60, %v2743_v38  ;;  %v2750_v60 = vld [vmem:[#allocation21_spill] sm:$0xff] }
 0x153   :  { %v929_v48 = vadd.f32 %v928_v56, %v2724_v31  ;;  %1638 = vmatprep.subr.bf16.mxu1 %v1637_v23 }
 0x154   :  { %1640 = vmatpush3.bf16.msra.mxu1 %v2725_v15 }
 0x155   :  { %v1643_v28 = vpack.c.bf16 %v934_v59, %v929_v48  ;;  %v1518_v44 = vpop.f32.mrb[38].mxu0  ;;  %1642 = vmatprep.subr.bf16.mxu1 %v2726_v27 }
 0x156   :  { %v944_v19 = vadd.f32 %v1518_v44, %v2727_v25  ;;  %v938_v47 = vpop.f32.mrb[39].mxu0 }
 0x157   :  { %v939_v5 = vadd.f32 %v938_v47, %v2728_v63  ;;  %1152 = vmatmul.mubr.f32.vlgmr.msra.gmra.mrb[26].mxu1 %v2729_v51 }
 0x158   :  { %1156 = vmatprep.mubr.f32.mxu1 %v2730_v43  ;;  %1644 = vmatpush3.bf16.msra.mxu1 %v1643_v28 }
 0x159   :  { %v1647_v52 = vpack.c.bf16 %v944_v19, %v939_v5  ;;  %v1521_v62 = vpop.f32.mrb[40].mxu0  ;;  %1646 = vmatprep.subr.bf16.mxu1 %v2731_v39 }
 0x15a   :  { %v954_v26 = vadd.f32 %v1521_v62, %v2732_v24  ;;  %v948_v54 = vpop.f32.mrb[41].mxu0 }
 0x15b   :  { %v949_v22 = vadd.f32 %v948_v54, %v2733_v50  ;;  %1157 = vmatmul.mubr.f32.gmra.mrb[28].mxu1 %v2734_v10 }
 0x15c   :  { %1648 = vmatpush3.bf16.msra.mxu1 %v1647_v52  ;;  %1226 = vmatprep.mubr.f32.mxu1 %v2735_v45 }
 0x15d   :  { %v1651_v9 = vpack.c.bf16 %v954_v26, %v949_v22  ;;  %v1524_v32 = vpop.f32.mrb[42].mxu0  ;;  %1650 = vmatprep.subr.bf16.mxu1 %v2736_v4 }
 0x15e   :  { %v964_v14 = vadd.f32 %v1524_v32, %v2737_v3  ;;  %v958_v35 = vpop.f32.mrb[43].mxu0 }
 0x15f   :  { %v959_v30 = vadd.f32 %v958_v35, %v2738_v53 }
 0x160   :  { %1652 = vmatpush3.bf16.msra.mxu1 %v1651_v9 }
 0x161   :  { %v1655_v13 = vpack.c.bf16 %v964_v14, %v959_v30  ;;  %v1527_v58 = vpop.f32.mrb[44].mxu0  ;;  %1654 = vmatprep.subr.bf16.mxu1 %v2739_v8 }
 0x162   :  { %v974_v18 = vadd.f32 %v1527_v58, %v2740_v7  ;;  %v968_v49 = vpop.f32.mrb[45].mxu0 }
 0x163   :  { %v969_v20 = vadd.f32 %v968_v49, %v2741_v17 }
 0x164   :  { %1656 = vmatpush3.bf16.msra.mxu1 %v1655_v13 }
 0x165   :  { %v1659_v0 = vpack.c.bf16 %v974_v18, %v969_v20  ;;  %1658 = vmatprep.subr.bf16.mxu1 %v2742_v33 }
 0x168   :  { %1660 = vmatpush3.bf16.msra.mxu1 %v1659_v0 }
 0x169   :  { %1662 = vmatprep.subr.bf16.mxu1 %v1661_v40  ;;  %v2749_v40 = vld [vmem:[#allocation14_spill] sm:$0xff] }
 0x16c   :  { %1664 = vmatpush3.bf16.msra.mxu1 %v2744_v12 }
 0x16d   :  { %1666 = vmatprep.subr.bf16.mxu1 %v1665_v2 }
 0x170   :  { %1668 = vmatpush3.bf16.msra.mxu1 %v2746_v11 }
 0x171   :  { %1670 = vmatprep.subr.bf16.mxu1 %v1669_v6 }
 0x174   :  { %1672 = vmatpush3.bf16.msra.mxu1 %v2748_v41 }
 0x177   :  { %1227 = vmatmul.mubr.f32.vlgmr.msra.gmra.mrb[30].mxu1 %v2749_v40 }
 0x178   :  { %1231 = vmatprep.mubr.f32.mxu1 %v2750_v60 }
 0x17b   :  { %1232 = vmatmul.mubr.f32.gmra.mrb[32].mxu1 %v2751_v57 }
 0x22a   :  { %v1389_v55 = vpop.f32.mrb[26].mxu1 }
 0x22b   :  { %v1390_v36 = vpop.f32.mrb[27].mxu1 }
 0x22c   :  { %v1391_v61 = vadd.f32 %v1390_v36, %v1389_v55 }
 0x22e   :  { %v1392_v2 = vpop.f32.mrb[28].mxu1 }
 0x22f   :  { %v1393_v34 = vpop.f32.mrb[29].mxu1 }
 0x230   :  { %v1394_v23 = vadd.f32 %v1393_v34, %v1392_v2 }
 0x24a   :  { %v1427_v29 = vpop.f32.mrb[30].mxu1 }
 0x24b   :  { %v1428_v21 = vpop.f32.mrb[31].mxu1 }
 0x24c   :  { %v1429_v1 = vadd.f32 %v1428_v21, %v1427_v29 }
 0x24e   :  { %v1229_v46 = vadd.f32 %v1429_v1, %v1391_v61  ;;  %v1430_v6 = vpop.f32.mrb[32].mxu1 }
 0x24f   :  { %v1431_v42 = vpop.f32.mrb[33].mxu1 }
 0x250   :  { %1238 = vst.msk [vmem:[%s2691_s6] sm:$0xff] %vm1237_vm1, %v1229_v46  ;;  %v1432_v59 = vadd.f32 %v1431_v42, %v1430_v6  ;;  %v1240_v56 = vsel %vm1237_vm1, %v1229_v46, -inf }
 0x251   :  { %1241 = vmax.xlane.f32.xlu0 %v1240_v56 }
 0x252   :  { %v1234_v31 = vadd.f32 %v1432_v59, %v1394_v23 }
 0x254   :  { %1239 = vst.msk [vmem:[%s2691_s6 + $0x8] sm:$0xff] %vm1237_vm1, %v1234_v31  ;;  %v1243_v48 = vsel %vm1237_vm1, %v1234_v31, -inf }
 0x255   :  { %1244 = vmax.xlane.f32.xlu1 %v1243_v48 }
 0x2de   :  { %v1242_v15 = vpop.xlane.xlu0 %1241 }
 0x2df   :  { %v1246_v28 = vsub.f32 %v1229_v46, %v1242_v15 }
 0x2e1   :  { %v1248_v44 = vmul.f32 1.442695, %v1246_v28 }
 0x2e2   :  { %v1245_v27 = vpop.xlane.xlu1 %1244 }
 0x2e3   :  { %1694 = vpow2.f32 %v1248_v44  ;;  %v1247_v25 = vsub.f32 %v1234_v31, %v1245_v27 }
 0x2e5   :  { %v1250_v19 = vmul.f32 1.442695, %v1247_v25 }
 0x2e7   :  { %1696 = vpow2.f32 %v1250_v19 }
 0x2ed   :  { %v1695_v47 = vpop.eup %1694 }
 0x2ee   :  { %v1252_v63 = vsel %vm1237_vm1, %v1695_v47, 0.0 }
 0x2ef   :  { %1253 = vadd.xlane.f32.xlu0 %v1252_v63 }
 0x2f1   :  { %v1697_v5 = vpop.eup %1696 }
 0x2f2   :  { %v1255_v51 = vsel %vm1237_vm1, %v1697_v5, 0.0 }
 0x2f3   :  { %1256 = vadd.xlane.f32.xlu0 %v1255_v51 }
 0x37c   :  { %v1254_v43 = vpop.xlane.xlu0 %1253 }
 0x37d   :  { %1698 = vrcp.f32 %v1254_v43 }
 0x380   :  { %v1257_v52 = vpop.xlane.xlu0 %1256 }
 0x381   :  { %1700 = vrcp.f32 %v1257_v52 }
 0x387   :  { %v1699_v62 = vpop.eup %1698 }
 0x388   :  { %v1259_v39 = vmul.f32 %v1699_v62, %v1695_v47 }
 0x38a   :  { %1262 = vst.msk [vmem:[%s2692_s7] sm:$0xff] %vm1237_vm1, %v1259_v39 }
 0x38b   :  { %v1701_v24 = vpop.eup %1700 }
 0x38c   :  { %v1261_v26 = vmul.f32 %v1701_v24, %v1697_v5 }
 0x38e   :  { %1263 = vst.msk [vmem:[%s2692_s7 + $0x8] sm:$0xff] %vm1237_vm1, %v1261_v26 }
 0x38f   :  { %1272 = vsyncpa [#allocation3], 1 }

</bundles_post_ra>
